<compile_context>
chip_gen: v6e
topology: v6e:2x2x1
jax: 0.10.0
libtpu: 0.0.40
codegen_flags: <defaults>
</compile_context>

<pallas_src>
import jax
import jax.numpy as jnp
from jax.experimental import pallas as pl
from jax.experimental.pallas import tpu as pltpu


_LANES = 128


def _round_up(x, m):
    return ((x + m - 1) // m) * m


def _sublane_pack(dtype):
    # rows per packed sublane group: 8 for 32-bit, 16 for 16-bit, 32 for 8-bit.
    return 32 // jnp.dtype(dtype).itemsize


def _duvenaud_kernel(h_w_ref, e_vw_ref, out_ref):
    # Build the concatenated tile in vregs and store it once per vreg-row.
    # For narrow widths (H+E < 128) this halves the masked-vst count vs. two
    # sliced stores; for 128-aligned widths the store lowers to unmasked vst
    # and the concatenate involves no cross-lane shuffle.  Casting happens
    # in-vreg so each operand is read from HBM exactly once at native dtype.
    out_ref[...] = jnp.concatenate(
        [h_w_ref[...].astype(out_ref.dtype),
         e_vw_ref[...].astype(out_ref.dtype)],
        axis=-1,
    )


def message_function_duvenaud(h_v, h_w, e_vw, *,
                              vmem_budget_bytes=20 << 20,
                              vmem_limit_bytes=28 << 20):
    """Pallas implementation of MessageFunction('duvenaud').forward(h_v, h_w, e_vw).

    h_v  : (B, H)        -- unused (kept for API parity with the PyTorch module)
    h_w  : (B, N, H)
    e_vw : (B, N, E)
    returns (B, N, H + E)
    """
    del h_v  # not used by the duvenaud message function
    B, N, H = h_w.shape
    _, _, E = e_vw.shape
    out_dtype = jnp.result_type(h_w.dtype, e_vw.dtype)

    rows = B * N
    # Flatten (B, N) -> rows: free (contiguous) reshape; gives one long row
    # axis so each grid step streams a large contiguous slab.
    h_w_2d = h_w.reshape(rows, H)
    e_vw_2d = e_vw.reshape(rows, E)

    sub = max(_sublane_pack(h_w.dtype),
              _sublane_pack(e_vw.dtype),
              _sublane_pack(out_dtype))

    # ---- row-tile size from the VMEM budget -------------------------------
    # VMEM footprint per row uses LANE-PADDED widths: a (R, 24) f32 block still
    # occupies 128 lanes per (8,128) tile, i.e. ~5x its raw bytes.
    vmem_row_bytes = (
        _round_up(H, _LANES) * jnp.dtype(h_w.dtype).itemsize
        + _round_up(E, _LANES) * jnp.dtype(e_vw.dtype).itemsize
        + _round_up(H + E, _LANES) * jnp.dtype(out_dtype).itemsize)

    # 2 inputs + 1 output, each double-buffered by the Pallas pipeline.
    rows_by_vmem = max(sub, vmem_budget_bytes // (2 * vmem_row_bytes))
    block_rows = int(min(rows, rows_by_vmem))

    # Guarantee >= 2 grid steps whenever the shape allows it so the "parallel"
    # row axis can be sharded across both TensorCores on v7x.
    if rows >= 2 * sub:
        block_rows = min(block_rows, _round_up(pl.cdiv(rows, 2), sub))

    if block_rows < rows:
        # Partial-extent row blocks must respect dtype sublane packing; the
        # last (possibly ragged) tile is handled by Pallas OOB masking.
        block_rows = max(sub, (block_rows // sub) * sub)
    else:
        block_rows = rows

    grid = (pl.cdiv(rows, block_rows),)

    # Actual HBM traffic (un-padded) for the scheduler: pure streaming, 0 flops.
    hbm_bytes = rows * (H * jnp.dtype(h_w.dtype).itemsize
                        + E * jnp.dtype(e_vw.dtype).itemsize
                        + (H + E) * jnp.dtype(out_dtype).itemsize)
    cost = pl.CostEstimate(flops=0, transcendentals=0, bytes_accessed=hbm_bytes)

    # Explicit scoped-VMEM limit: covers the pipelined buffers with headroom,
    # above v5e's 16 MiB default scope, comfortably under v7x's 64 MiB physical.
    needed_vmem = 2 * _round_up(block_rows, sub) * vmem_row_bytes
    vmem_limit = int(max(vmem_limit_bytes, needed_vmem + (4 << 20)))

    out_2d = pl.pallas_call(
        _duvenaud_kernel,
        out_shape=jax.ShapeDtypeStruct((rows, H + E), out_dtype),
        grid=grid,
        in_specs=[
            pl.BlockSpec((block_rows, H), lambda r: (r, 0)),
            pl.BlockSpec((block_rows, E), lambda r: (r, 0)),
        ],
        out_specs=pl.BlockSpec((block_rows, H + E), lambda r: (r, 0)),
        compiler_params=pltpu.CompilerParams(
            dimension_semantics=("parallel",),
            vmem_limit_bytes=vmem_limit,
        ),
        cost_estimate=cost,
    )(h_w_2d, e_vw_2d)

    return out_2d.reshape(B, N, H + E)


def _reference(h_w, e_vw):
    return jnp.concatenate([h_w, e_vw], axis=2)


if __name__ == "__main__":
    key = jax.random.PRNGKey(0)
    k1, k2, k3, k4, k5 = jax.random.split(key, 5)

    # --- small shapes consistent with the module --------------------------
    B, N, H, E = 2, 8, 16, 8   # batch, neighbors, hidden size, edge-feature size
    h_v = jax.random.normal(k1, (B, H), dtype=jnp.float32)
    h_w = jax.random.normal(k2, (B, N, H), dtype=jnp.float32)
    e_vw = jax.random.normal(k3, (B, N, E), dtype=jnp.float32)

    out = jax.block_until_ready(message_function_duvenaud(h_v, h_w, e_vw))
    ref = _reference(h_w, e_vw)
    assert out.shape == (B, N, H + E)
    assert out.dtype == ref.dtype
    assert jnp.array_equal(out, ref), "mismatch vs reference (f32 case)"

    # --- mixed-dtype case: cast happens inside the kernel -------------------
    # (torch.cat would reject mixed dtypes; this path is a documented extension)
    h_w_bf = h_w.astype(jnp.bfloat16)
    out_mixed = jax.block_until_ready(message_function_duvenaud(h_v, h_w_bf, e_vw))
    ref_mixed = _reference(h_w_bf, e_vw)
    assert out_mixed.dtype == ref_mixed.dtype
    assert jnp.array_equal(out_mixed, ref_mixed), "mismatch vs reference (mixed dtype)"

    # --- multi-step row grid incl. a ragged final tile ----------------------
    B2, N2 = 2, 1000   # rows = 2000, small budget -> several tiles + partial last
    h_w2 = jax.random.normal(k4, (B2, N2, H), dtype=jnp.float32)
    e_vw2 = jax.random.normal(k5, (B2, N2, E), dtype=jnp.float32)
    h_v2 = jnp.zeros((B2, H), dtype=jnp.float32)
    out2 = jax.block_until_ready(
        message_function_duvenaud(h_v2, h_w2, e_vw2, vmem_budget_bytes=1 << 20))
    assert jnp.array_equal(out2, _reference(h_w2, e_vw2)), "mismatch (tiled rows)"

    print("KERNEL_OK")
</pallas_src>

<mosaic_0001>
module attributes {stable_mosaic.version = 11 : i64} {
  func.func @_duvenaud_kernel(%arg0: i32, %arg1: memref<8x16xf32, #tpu.memory_space<vmem>>, %arg2: memref<8x8xf32, #tpu.memory_space<vmem>>, %arg3: memref<8x24xf32, #tpu.memory_space<vmem>>) attributes {dimension_semantics = [#tpu.dimension_semantics<parallel>], iteration_bounds = array<i64: 2>, scalar_prefetch = 0 : i64, scratch_operands = 0 : i64, tpu.core_type = #tpu.core_type<tc>, window_params = [{transform_indices = @transform_0, window_bounds = array<i64: 8, 16>}, {transform_indices = @transform_1, window_bounds = array<i64: 8, 8>}, {transform_indices = @transform_2, window_bounds = array<i64: 8, 24>}]} {
    %c0 = arith.constant 0 : index
    %c0_0 = arith.constant 0 : index
    %0 = vector.load %arg1[%c0, %c0_0] : memref<8x16xf32, #tpu.memory_space<vmem>>, vector<8x16xf32>
    %c0_1 = arith.constant 0 : index
    %c0_2 = arith.constant 0 : index
    %1 = vector.load %arg2[%c0_1, %c0_2] : memref<8x8xf32, #tpu.memory_space<vmem>>, vector<8x8xf32>
    %2 = tpu.concatenate %0, %1 in 1 : vector<8x16xf32>, vector<8x8xf32> -> vector<8x24xf32>
    %c0_3 = arith.constant 0 : index
    %c0_4 = arith.constant 0 : index
    %3 = vector.load %arg3[%c0_3, %c0_4] : memref<8x24xf32, #tpu.memory_space<vmem>>, vector<8x24xf32>
    tpu.vector_store %arg3[%c0_3, %c0_4], %2 {strides = array<i32>} : memref<8x24xf32, #tpu.memory_space<vmem>>, vector<8x24xf32>,
    return
  }
  func.func @transform_0(%arg0: i32) -> (i32, i32) {
    %c0_i32 = arith.constant 0 : i32
    %c0_i32_0 = arith.constant 0 : i32
    return %arg0, %c0_i32 : i32, i32
  }
  func.func @transform_1(%arg0: i32) -> (i32, i32) {
    %c0_i32 = arith.constant 0 : i32
    %c0_i32_0 = arith.constant 0 : i32
    return %arg0, %c0_i32 : i32, i32
  }
  func.func @transform_2(%arg0: i32) -> (i32, i32) {
    %c0_i32 = arith.constant 0 : i32
    %c0_i32_0 = arith.constant 0 : i32
    return %arg0, %c0_i32 : i32, i32
  }
}

</mosaic_0001>

<bundles_post_ra>
// kernel: tpu_custom_call.1
= control target key start
LH: loop header
LB: loop body
LE: loop exit
PB: predicated region body
PF: predicated region fallthrough
CT: control target
= control target key end

     0   :  { %7 = vsyncpa [#allocation3], 0  ;;  %s477_s0 = inlined_call_operand.vmem [shape: f32[16,16], index: 0, kind: input, shape index: {}]   ;;  %s478_s1 = inlined_call_operand.vmem [shape: f32[16,8], index: 1, kind: input, shape index: {}]   ;;  %s479_s2 = inlined_call_operand.hbm [shape: f32[16,24], index: 2, kind: output, shape index: {}]  }
   0x1   :  { %9 = vsyncpa [#allocation3 + $0x1], 0  ;;  %s381_s9 = smov 0   ;;  %s383_s10 = smov 0  }
   0x2   :  { %s385_s11 = smov 0   ;;  %s387_s12 = smov 0  }
   0x3 LB: > { %s402_s13 = sadd.s32 4294967295, %s362_s12   ;;  %s251_s14 = sadd.s32 4294967294, %s362_s12   ;;  %s362_s12 = sphi %s387_s12, %s485_s12   ;;  %s358_s11 = sphi %s385_s11, %s484_s11   ;;  %s354_s10 = sphi %s383_s10, %s483_s10   ;;  %s350_s9 = sphi %s381_s9, %s482_s9  }
   0x4   : > { %s406_s15 = sadd.s32 1, %s362_s12   ;;  %s74_s16 = sadd.s32 1, %s358_s11 }
   0x5   : > { %s71_s17 = ssub.s32 %s362_s12, %s406_s15  ;;  %p84_p0 = scmp.ne.s32.totalorder %s358_s11, %s354_s10 }
   0x6   : > { %p72_p1 = scmp.eq.s32.totalorder %s71_s17, 0  ;;  %p85_p2 = scmp.eq.s32.totalorder %s402_s13, 1 }
   0x7   : > { %p90_p3 = scmp.ne.s32.totalorder %s354_s10, %s350_s9  ;;  %p91_p4 = scmp.eq.s32.totalorder %s251_s14, 1 }
   0x8   : > { %s417_s18 = scalar_select %p72_p1, %s358_s11, %s74_s16  }
   0x9   : > { %p419_p5 = por %p85_p2, %p84_p0  ;;  %p423_p6 = por %p91_p4, %p90_p3 }
   0xa   : > { %p254_p7 = scmp.ge.s32.totalorder %s362_s12, 1  ;;  %p123_p8 = scmp.lt.s32.totalorder %s362_s12, 3 }
   0xc   : > { %p124_p9 = pnand %p254_p7, %p123_p8 }
   0xd   : > { %p148_p10 = scmp.lt.s32.totalorder (!%p124_p9), %s402_s13, 1  ;;  %s364_s26 = smov (!%p124_p9), 16  }
   0xe   : > { %127 = sbr.rel (%p124_p9) target bundleno = 153 (0x99), region = 28  ;;  %s145_s27 = sand.u32 (!%p124_p9), 1, %s354_s10  }
   0xf   : > { %s255_s28 = sshll.u32 (!%p124_p9), %s145_s27, 3  ;;  %s259_s4 = sshll.u32 (!%p124_p9), %s402_s13, 7 }
  0x10   : > { %s147_s5 = scalar_lea.vmem (!%p124_p9), [#allocation2], %s255_s28  ;;  %s442_s14 = scalar_lea.hbm (!%p124_p9), %s479_s2, %s259_s4 }
  0x11   : > { %s180_s6 = sshll.u32 (!%p124_p9), %s147_s5, 4  ;;  %s167_s16 = scalar_lea.sflag (!%p124_p9), [#allocation3], %s145_s27  ;;  %s181_s6 = int_to_ptr.vmem [resolvable:$true] %s180_s6 }
  0x12   : > { %s302_s17 = scalar_lea.vmem (!%p124_p9), %s181_s6, 128 }
  0x13   : > { %s149_s21 = scalar_select %p148_p10, %s402_s13, 1  ;;  %vm162_vm0 = vcmask 130048   ;;  %vm164_vm1 = vcmask 195584  }
  0x14   : > { %p303_p11 = scmp.ne.s32.totalorder %s181_s6, %s302_s17  ;;  %s365_s13 = smov [#allocation2]  }
  0x15   : > { %s256_s22 = sshll.u32 %s149_s21, 3  ;;  %s306_s21 = sshll.u32 %s365_s13, 4  ;;  %s307_s21 = int_to_ptr.vmem [resolvable:$false] %s306_s21 }
  0x16   : > { %s155_s25 = scalar_lea.vmem %s478_s1, %s256_s22  ;;  %s151_s3 = scalar_lea.vmem %s477_s0, %s256_s22 }
  0x17   : > { %v157_v0 = vld [vmem:[%s155_s25] sm:$0xff]  ;;  %p304_p12 = pnand %p303_p11, %p419_p5  ;;  %s308_s22 = scalar_lea.vmem %s307_s21, 256 }
  0x18   : > { %159 = vrot.lane.b32.xlu0 %v157_v0, %s364_s26  ;;  %v156_v1 = vld [vmem:[%s151_s3] sm:$0xff]  ;;  %p309_p0 = scmp.lt.s32.totalorder %s181_s6, %s307_s21  ;;  %p310_p1 = scmp.lt.s32.totalorder %s308_s22, %s302_s17 }
  0x19   : > { %p305_p13 = pneg %p304_p12 }
  0x1a   : > { %p311_p2 = por %p310_p1, %p309_p0 }
  0x1c   : > { %p312_p3 = pnand %p311_p2, %p305_p13 }
  0x8a   : > { %v160_v2 = vpop.permute.xlu0 %159 }
  0x8b   : > { %v163_v3 = vsel %vm162_vm0, %v156_v1, %v160_v2 }
  0x8c   : > { %165 = vst.msk [vmem:[%s147_s5] sm:$0xff] %vm164_vm1, %v163_v3 }
  0x8d   : > { %315 = shalt.err (!%p312_p3)
}
  0x8e   : > { %s316_s23 = scalar_lea.hbm %s442_s14, 128  ;;  %s320_s26 = scalar_lea.hbm %s479_s2, 256 }
  0x8f   : > { %p317_p4 = scmp.ne.s32.totalorder %s442_s14, %s316_s23  ;;  %p321_p9 = scmp.lt.s32.totalorder %s442_s14, %s479_s2 }
  0x90   : > { %p322_p10 = scmp.lt.s32.totalorder %s320_s26, %s316_s23 }
  0x91   : > { %p318_p7 = pnand %p317_p4, %p419_p5 }
  0x92   : > { %p323_p11 = por %p322_p10, %p321_p9 }
  0x93   : > { %p319_p8 = pneg %p318_p7 }
  0x95   : > { %p324_p12 = pnand %p323_p11, %p319_p8 }
  0x97   : > { %327 = shalt.err (!%p324_p12)
}
  0x98   : > { %262 = dma.vmem_to_hbm [thread:$0]  (%p419_p5), %s181_s6, 128, %s442_s14, %s167_s16  }
  0x99 PF: > { %p268_p13 = scmp.ge.s32.totalorder %s362_s12, 2  ;;  %s192_s29 = sand.u32 1, %s350_s9  }
  0x9a   : > { %s193_s30 = scalar_lea.sflag [#allocation3], %s192_s29 }
  0x9b   : > { %p265_p0 = pnand %p268_p13, %p423_p6 }
  0x9d   : > { %p266_p1 = pneg %p265_p0 }
  0x9f   : > { %345 = dma.done.wait (%p266_p1), %s193_s30, 128  }
  0xa0   : > { %347 = vsyncadd (%p266_p1), %s193_s30, 4294967168  ;;  %p12_p2 = scmp.ge.s32.totalorder %s406_s15, 4   ;;  %s482_s9 = smov %s354_s10 }
  0xa1   : > { %s483_s10 = smov %s358_s11  ;;  %s484_s11 = smov %s417_s18 }
  0xa2   : > { %s485_s12 = smov %s406_s15  ;;  %14 = sbr.rel (!%p12_p2) target bundleno = 3 (0x3), region = 66 }
  0xa7   :  { %198 = vsyncpa [#allocation3], 1 }
  0xa8   :  { %200 = vsyncpa [#allocation3 + $0x1], 1 }

</bundles_post_ra>
